<compile_context>
chip_gen: v7x
topology: tpu7x:2x2x1
jax: 0.10.0
libtpu: 0.0.40
codegen_flags: <defaults>
</compile_context>

<pallas_src>
import functools

import jax
import jax.numpy as jnp
from jax.experimental import pallas as pl
from jax.experimental.pallas import tpu as pltpu


def _round_up(x: int, m: int) -> int:
    return ((x + m - 1) // m) * m


def _vmem_limit_bytes() -> int:
    """Scoped-VMEM limit to request: ~3/4 of per-core capacity, capped at 96 MiB."""
    try:
        cap = int(pltpu.get_tpu_info().vmem_capacity_bytes)
    except Exception:            # conservative fallback = v7x per-core VMEM
        cap = 64 * 1024 * 1024
    return max(32 * 1024 * 1024, min(cap * 3 // 4, 96 * 1024 * 1024))


def _num_tensorcores() -> int:
    """Best-effort TensorCores-per-chip (2 on v7x, 1 on v5e/v6e)."""
    try:
        info = pltpu.get_tpu_info()
        for attr in ("num_cores", "num_tensorcores", "tensorcores_per_chip",
                     "cores_per_chip"):
            v = getattr(info, attr, None)
            if v:
                return max(1, int(v))
    except Exception:
        pass
    try:
        return max(1, int(getattr(jax.devices()[0], "num_cores", 1)))
    except Exception:
        return 1


def _sublane_multiple(itemsize: int) -> int:
    # f32 -> 8, bf16/f16 -> 16, int8/fp8 -> 32 (sub-32-bit dtypes pack sublanes).
    return max(8, 32 // max(1, itemsize))


def _choose_tile_n(n: int, c: int, logits_dtype, vmem_limit: int) -> int:
    """Byte-budgeted batch tile: ~2-6 MiB logits blocks, lane-padding aware."""
    itemsize = jnp.dtype(logits_dtype).itemsize
    sub = _sublane_multiple(itemsize)
    lane_c = _round_up(max(c, 1), 128)            # lanes pad to 128 when C < 128
    # VMEM bytes per tile row: double-buffered logits block (native dtype) +
    # double-buffered lane-padded (tile_n,1)->(tile_n,128) int32 labels block +
    # ~2 f32-block-equivalents of in-kernel temporaries.
    per_row = 2 * lane_c * itemsize + 2 * 128 * 4 + 2 * lane_c * 4
    budget = min(vmem_limit // 2, 24 * 1024 * 1024)
    rows = budget // per_row
    rows = min(rows, 16384)
    rows = max(sub, (rows // sub) * sub)
    rows = min(rows, _round_up(max(n, 1), sub))
    return rows


def _ece_kernel(logits_ref, labels_ref, out_ref, *,
                n_bins: int, n_valid: int, tile_n: int, tiles_per_split: int):
    s = pl.program_id(0)          # "parallel": megacore split (2 TCs on v7x)
    i = pl.program_id(1)          # "arbitrary": sequential batch reduction

    @pl.when(i == 0)
    def _init():
        out_ref[...] = jnp.zeros_like(out_ref)

    logits = logits_ref[...].astype(jnp.float32)           # (tile_n, C) f32
    labels = labels_ref[...]                               # (tile_n, 1) int32
    tn, c = logits.shape

    # softmax confidence = max prob = 1 / sum(exp(l - max)); exact divide on
    # purpose (it feeds strict bin-boundary comparisons).
    row_max = jnp.max(logits, axis=1, keepdims=True)
    denom = jnp.sum(jnp.exp(logits - row_max), axis=1, keepdims=True)
    confidences = 1.0 / denom                              # (tile_n, 1)

    # argmax (first occurrence, matching torch) -> accuracy
    col_ids = jax.lax.broadcasted_iota(jnp.int32, (tn, c), 1)
    predictions = jnp.min(jnp.where(logits == row_max, col_ids, c),
                          axis=1, keepdims=True)           # (tile_n, 1)
    accuracies = (predictions == labels).astype(jnp.float32)

    # Ragged-tail / duplicated-grid-point mask.  A select (not a multiply) so
    # NaN/Inf garbage in out-of-bounds rows cannot leak through 0*NaN.
    tile_idx = s * tiles_per_split + i
    row_ids = jax.lax.broadcasted_iota(jnp.int32, (tn, 1), 0) + tile_idx * tile_n
    valid = row_ids < n_valid
    confidences = jnp.where(valid, confidences, 0.0)       # conf==0 -> no bin
    accuracies = jnp.where(valid, accuracies, 0.0)

    # Vectorized bin membership (tile_n, n_bins); bin b is (b/n_bins, (b+1)/n_bins].
    bin_ids = jax.lax.broadcasted_iota(jnp.int32, (1, n_bins), 1).astype(jnp.float32)
    lowers = bin_ids / n_bins
    uppers = (bin_ids + 1.0) / n_bins
    in_bin_f = jnp.logical_and(confidences > lowers,
                               confidences <= uppers).astype(jnp.float32)

    # Per-bin partial sums on the (otherwise idle) MXU:
    #   [conf | acc]^T @ in_bin -> (2, n_bins),
    # accumulated straight into out_ref, which stays VMEM-resident along i.
    conf_acc = jnp.concatenate([confidences, accuracies], axis=1)   # (tile_n, 2)
    out_ref[...] += jax.lax.dot_general(
        conf_acc, in_bin_f, (((0,), (0,)), ((), ())),
        preferred_element_type=jnp.float32)


def ece_loss(logits, labels, n_bins: int = 15, tile_n=None, n_splits=None):
    """Pallas implementation of _ECELoss.forward. Returns shape (1,) float32."""
    n, c = logits.shape
    # No wrapper-side cast/pad of logits: stream them in their native dtype and
    # cast per-tile in VMEM; the ragged tail is handled by the in-kernel mask.
    labels_2d = labels.reshape(n, 1).astype(jnp.int32)

    vmem_limit = _vmem_limit_bytes()
    itemsize = jnp.dtype(logits.dtype).itemsize
    sub = _sublane_multiple(itemsize)

    if tile_n is None:
        tile_n = _choose_tile_n(n, c, logits.dtype, vmem_limit)
    tile_n = int(tile_n)
    if tile_n >= n:
        tile_n = n                        # single full-extent block
    else:
        tile_n = max(sub, (tile_n // sub) * sub)

    tiles = -(-n // tile_n)
    if n_splits is None:
        n_splits = _num_tensorcores() if tiles >= 2 else 1
    n_splits = max(1, min(int(n_splits), tiles))
    tiles_per_split = -(-tiles // n_splits)        # pad the grid, not the data

    def block_idx(s, i):
        # Clamp duplicated grid points (grid padding) onto the last real block;
        # the in-kernel row mask zeroes their contribution.
        return jnp.minimum(s * tiles_per_split + i, tiles - 1)

    kernel = functools.partial(
        _ece_kernel, n_bins=n_bins, n_valid=n, tile_n=tile_n,
        tiles_per_split=tiles_per_split)

    partials = pl.pallas_call(
        kernel,
        out_shape=jax.ShapeDtypeStruct((n_splits, 2, n_bins), jnp.float32),
        grid=(n_splits, tiles_per_split),
        in_specs=[
            pl.BlockSpec((tile_n, c), lambda s, i: (block_idx(s, i), 0)),
            pl.BlockSpec((tile_n, 1), lambda s, i: (block_idx(s, i), 0)),
        ],
        out_specs=pl.BlockSpec((None, 2, n_bins), lambda s, i: (s, 0, 0)),
        compiler_params=pltpu.CompilerParams(
            dimension_semantics=("parallel", "arbitrary"),
            vmem_limit_bytes=vmem_limit),
        cost_estimate=pl.CostEstimate(
            flops=10 * n * c,
            transcendentals=n * c,
            bytes_accessed=n * c * itemsize + 4 * n + 8 * n_splits * n_bins),
    )(logits, labels_2d)

    totals = jnp.sum(partials, axis=0)                     # (2, n_bins)
    # ECE = sum_b |S_conf[b] - S_acc[b]| / N  (empty bins contribute 0).
    ece = jnp.sum(jnp.abs(totals[0] - totals[1])) / jnp.float32(n)
    return ece.reshape(1)


def _ece_reference(logits, labels, n_bins: int = 15):
    """Pure-JAX reference mirroring the PyTorch module (for a sanity check)."""
    softmaxes = jax.nn.softmax(logits.astype(jnp.float32), axis=1)
    confidences = jnp.max(softmaxes, axis=1)
    predictions = jnp.argmax(softmaxes, axis=1)
    accuracies = (predictions == labels).astype(jnp.float32)
    ece = jnp.zeros((1,), jnp.float32)
    for b in range(n_bins):
        lo, hi = b / n_bins, (b + 1) / n_bins
        in_bin = jnp.logical_and(confidences > lo, confidences <= hi).astype(jnp.float32)
        count = jnp.sum(in_bin)
        prop = count / confidences.shape[0]
        safe = jnp.maximum(count, 1.0)
        acc_in = jnp.sum(accuracies * in_bin) / safe
        conf_in = jnp.sum(confidences * in_bin) / safe
        ece = ece + jnp.where(count > 0, jnp.abs(conf_in - acc_in) * prop, 0.0)
    return ece


if __name__ == "__main__":
    key = jax.random.PRNGKey(0)
    k1, k2, k3, k4 = jax.random.split(key, 4)

    # Small single-block case with auto-chosen tiling.
    batch, num_classes = 8, 16
    logits = jax.random.normal(k1, (batch, num_classes), dtype=jnp.float32) * 3.0
    labels = jax.random.randint(k2, (batch,), 0, num_classes, dtype=jnp.int32)
    ece = ece_loss(logits, labels, n_bins=15)
    jax.block_until_ready(ece)
    ref = _ece_reference(logits, labels, n_bins=15)
    assert ece.shape == (1,)
    assert jnp.allclose(ece, ref, atol=1e-5), (ece, ref)

    # Multi-tile / 2-split / ragged-tail path (forced tiny tile): exercises the
    # grid padding + index clamp, the NaN-safe row mask and the out_ref
    # accumulator across batch tiles.
    batch2, num_classes2 = 52, 16
    logits2 = jax.random.normal(k3, (batch2, num_classes2), dtype=jnp.float32) * 3.0
    labels2 = jax.random.randint(k4, (batch2,), 0, num_classes2, dtype=jnp.int32)
    ece2 = ece_loss(logits2, labels2, n_bins=15, tile_n=8, n_splits=2)
    jax.block_until_ready(ece2)
    ref2 = _ece_reference(logits2, labels2, n_bins=15)
    assert ece2.shape == (1,)
    assert jnp.allclose(ece2, ref2, atol=1e-5), (ece2, ref2)

    # Native-dtype streaming path (no wrapper-side cast): bf16 logits.
    logits_bf16 = logits2.astype(jnp.bfloat16)
    ece3 = ece_loss(logits_bf16, labels2, n_bins=15)
    jax.block_until_ready(ece3)
    ref3 = _ece_reference(logits_bf16, labels2, n_bins=15)
    assert ece3.shape == (1,)
    assert jnp.allclose(ece3, ref3, atol=1e-5), (ece3, ref3)

    print("KERNEL_OK")
</pallas_src>

<mosaic_0001>
module attributes {stable_mosaic.version = 11 : i64} {
  func.func @_ece_kernel(%arg0: i32, %arg1: i32, %arg2: memref<8x16xf32, #tpu.memory_space<vmem>>, %arg3: memref<8x1xi32, #tpu.memory_space<vmem>>, %arg4: memref<1x2x15xf32, #tpu.memory_space<vmem>>) attributes {dimension_semantics = [#tpu.dimension_semantics<parallel>, #tpu.dimension_semantics<arbitrary>], iteration_bounds = array<i64: 1, 1>, scalar_prefetch = 0 : i64, scratch_operands = 0 : i64, tpu.core_type = #tpu.core_type<tc>, window_params = [{transform_indices = @transform_0, window_bounds = array<i64: 8, 16>}, {transform_indices = @transform_1, window_bounds = array<i64: 8, 1>}, {transform_indices = @transform_2, window_bounds = array<i64: 1, 2, 15>}]} {
    %c0_i32 = arith.constant 0 : i32
    %0 = arith.cmpi eq, %arg1, %c0_i32 : i32
    %1 = arith.extui %0 : i1 to i32
    %c0_i32_0 = arith.constant 0 : i32
    %2 = arith.cmpi ne, %1, %c0_i32_0 : i32
    scf.if %2 {
      %cst_20 = arith.constant 0.000000e+00 : f32
      %61 = vector.broadcast %cst_20 : f32 to vector<2x15xf32>
      %c0_21 = arith.constant 0 : index
      %c0_22 = arith.constant 0 : index
      %c0_23 = arith.constant 0 : index
      %62 = vector.load %arg4[%c0_21, %c0_22, %c0_23] : memref<1x2x15xf32, #tpu.memory_space<vmem>>, vector<1x2x15xf32>
      %63 = vector.shape_cast %62 : vector<1x2x15xf32> to vector<2x15xf32>
      %64 = vector.shape_cast %61 : vector<2x15xf32> to vector<1x2x15xf32>
      tpu.vector_store %arg4[%c0_21, %c0_22, %c0_23], %64 {strides = array<i32>} : memref<1x2x15xf32, #tpu.memory_space<vmem>>, vector<1x2x15xf32>,
    } else {
    }
    %c0 = arith.constant 0 : index
    %c0_1 = arith.constant 0 : index
    %3 = vector.load %arg2[%c0, %c0_1] : memref<8x16xf32, #tpu.memory_space<vmem>>, vector<8x16xf32>
    %c0_2 = arith.constant 0 : index
    %c0_3 = arith.constant 0 : index
    %4 = vector.load %arg3[%c0_2, %c0_3] : memref<8x1xi32, #tpu.memory_space<vmem>>, vector<8x1xi32>
    %cst = arith.constant dense<0xFF800000> : vector<8xf32>
    %5 = vector.multi_reduction <maximumf>, %3, %cst [1] : vector<8x16xf32> to vector<8xf32>
    %6 = vector.shape_cast %5 : vector<8xf32> to vector<8x1xf32>
    %7 = vector.broadcast %6 : vector<8x1xf32> to vector<8x16xf32>
    %8 = arith.subf %3, %7 : vector<8x16xf32>
    %9 = math.exp %8 : vector<8x16xf32>
    %cst_4 = arith.constant dense<0.000000e+00> : vector<8xf32>
    %10 = vector.multi_reduction <add>, %9, %cst_4 [1] : vector<8x16xf32> to vector<8xf32>
    %11 = vector.shape_cast %10 : vector<8xf32> to vector<8x1xf32>
    %cst_5 = arith.constant 1.000000e+00 : f32
    %12 = vector.broadcast %cst_5 : f32 to vector<8x1xf32>
    %13 = arith.divf %12, %11 : vector<8x1xf32>
    %14 = tpu.iota {dimensions = array<i32: 1>} : vector<8x16xi32>
    %15 = vector.broadcast %6 : vector<8x1xf32> to vector<8x16xf32>
    %16 = arith.cmpf oeq, %3, %15 : vector<8x16xf32>
    %c16_i32 = arith.constant 16 : i32
    %17 = vector.broadcast %c16_i32 : i32 to vector<8x16xi32>
    %18 = arith.select %16, %14, %17 : vector<8x16xi1>, vector<8x16xi32>
    %cst_6 = arith.constant dense<2147483647> : vector<8xi32>
    %19 = vector.multi_reduction <minsi>, %18, %cst_6 [1] : vector<8x16xi32> to vector<8xi32>
    %20 = vector.shape_cast %19 : vector<8xi32> to vector<8x1xi32>
    %21 = arith.cmpi eq, %20, %4 : vector<8x1xi32>
    %22 = arith.extui %21 : vector<8x1xi1> to vector<8x1xi32>
    %23 = arith.sitofp %22 : vector<8x1xi32> to vector<8x1xf32>
    %c1_i32 = arith.constant 1 : i32
    %24 = arith.muli %arg0, %c1_i32 : i32
    %25 = arith.addi %24, %arg1 : i32
    %26 = tpu.iota {dimensions = array<i32: 0>} : vector<8x1xi32>
    %c8_i32 = arith.constant 8 : i32
    %27 = arith.muli %25, %c8_i32 : i32
    %28 = vector.broadcast %27 : i32 to vector<8x1xi32>
    %29 = arith.addi %26, %28 : vector<8x1xi32>
    %c8_i32_7 = arith.constant 8 : i32
    %30 = vector.broadcast %c8_i32_7 : i32 to vector<8x1xi32>
    %31 = arith.cmpi slt, %29, %30 : vector<8x1xi32>
    %cst_8 = arith.constant 0.000000e+00 : f32
    %32 = vector.broadcast %cst_8 : f32 to vector<8x1xf32>
    %33 = arith.select %31, %13, %32 : vector<8x1xi1>, vector<8x1xf32>
    %cst_9 = arith.constant 0.000000e+00 : f32
    %34 = vector.broadcast %cst_9 : f32 to vector<8x1xf32>
    %35 = arith.select %31, %23, %34 : vector<8x1xi1>, vector<8x1xf32>
    %36 = tpu.iota {dimensions = array<i32: 1>} : vector<1x15xi32>
    %37 = arith.sitofp %36 : vector<1x15xi32> to vector<1x15xf32>
    %cst_10 = arith.constant 1.500000e+01 : f32
    %38 = vector.broadcast %cst_10 : f32 to vector<1x15xf32>
    %39 = arith.divf %37, %38 : vector<1x15xf32>
    %cst_11 = arith.constant 1.000000e+00 : f32
    %40 = vector.broadcast %cst_11 : f32 to vector<1x15xf32>
    %41 = arith.addf %37, %40 : vector<1x15xf32>
    %cst_12 = arith.constant 1.500000e+01 : f32
    %42 = vector.broadcast %cst_12 : f32 to vector<1x15xf32>
    %43 = arith.divf %41, %42 : vector<1x15xf32>
    %44 = vector.broadcast %33 : vector<8x1xf32> to vector<8x15xf32>
    %45 = vector.broadcast %39 : vector<1x15xf32> to vector<8x15xf32>
    %46 = arith.cmpf ogt, %44, %45 : vector<8x15xf32>
    %47 = vector.broadcast %33 : vector<8x1xf32> to vector<8x15xf32>
    %48 = vector.broadcast %43 : vector<1x15xf32> to vector<8x15xf32>
    %49 = arith.cmpf ole, %47, %48 : vector<8x15xf32>
    %50 = arith.andi %46, %49 : vector<8x15xi1>
    %51 = arith.extui %50 : vector<8x15xi1> to vector<8x15xi32>
    %52 = arith.sitofp %51 : vector<8x15xi32> to vector<8x15xf32>
    %53 = tpu.concatenate %33, %35 in 1 : vector<8x1xf32>, vector<8x1xf32> -> vector<8x2xf32>
    %c0_13 = arith.constant 0 : index
    %c0_14 = arith.constant 0 : index
    %c0_15 = arith.constant 0 : index
    %54 = vector.load %arg4[%c0_13, %c0_14, %c0_15] : memref<1x2x15xf32, #tpu.memory_space<vmem>>, vector<1x2x15xf32>
    %55 = vector.shape_cast %54 : vector<1x2x15xf32> to vector<2x15xf32>
    %cst_16 = arith.constant dense<0.000000e+00> : vector<2x15xf32>
    %56 = tpu.matmul %53, %52, %cst_16 {dimension_numbers = #tpu.dot_dimension_numbers<[0], [0], [1], [1], [0, 1, 1, 1], [], []>} : vector<8x2xf32>, vector<8x15xf32>, vector<2x15xf32> -> vector<2x15xf32>
    %57 = arith.addf %55, %56 : vector<2x15xf32>
    %c0_17 = arith.constant 0 : index
    %c0_18 = arith.constant 0 : index
    %c0_19 = arith.constant 0 : index
    %58 = vector.load %arg4[%c0_17, %c0_18, %c0_19] : memref<1x2x15xf32, #tpu.memory_space<vmem>>, vector<1x2x15xf32>
    %59 = vector.shape_cast %58 : vector<1x2x15xf32> to vector<2x15xf32>
    %60 = vector.shape_cast %57 : vector<2x15xf32> to vector<1x2x15xf32>
    tpu.vector_store %arg4[%c0_17, %c0_18, %c0_19], %60 {strides = array<i32>} : memref<1x2x15xf32, #tpu.memory_space<vmem>>, vector<1x2x15xf32>,
    return
  }
  func.func @transform_0(%arg0: i32, %arg1: i32) -> (i32, i32) {
    %c1_i32 = arith.constant 1 : i32
    %0 = arith.muli %arg0, %c1_i32 : i32
    %1 = arith.addi %0, %arg1 : i32
    %c0_i32 = arith.constant 0 : i32
    %2 = arith.minsi %1, %c0_i32 : i32
    %c0_i32_0 = arith.constant 0 : i32
    %c0_i32_1 = arith.constant 0 : i32
    return %2, %c0_i32_0 : i32, i32
  }
  func.func @transform_1(%arg0: i32, %arg1: i32) -> (i32, i32) {
    %c1_i32 = arith.constant 1 : i32
    %0 = arith.muli %arg0, %c1_i32 : i32
    %1 = arith.addi %0, %arg1 : i32
    %c0_i32 = arith.constant 0 : i32
    %2 = arith.minsi %1, %c0_i32 : i32
    %c0_i32_0 = arith.constant 0 : i32
    %c0_i32_1 = arith.constant 0 : i32
    return %2, %c0_i32_0 : i32, i32
  }
  func.func @transform_2(%arg0: i32, %arg1: i32) -> (i32, i32, i32) {
    %c0_i32 = arith.constant 0 : i32
    %c0_i32_0 = arith.constant 0 : i32
    %c0_i32_1 = arith.constant 0 : i32
    return %arg0, %c0_i32, %c0_i32_0 : i32, i32, i32
  }
}

</mosaic_0001>

<bundles_post_ra>
// kernel: tpu_custom_call.1
= control target key start
LH: loop header
LB: loop body
LE: loop exit
PB: predicated region body
PF: predicated region fallthrough
CT: control target
= control target key end

     0   :  { %vm74_vm0 = vcmask 130048   ;;  %s354_s0 = inlined_call_operand.vmem [shape: f32[8,16], index: 0, kind: input, shape index: {}]   ;;  %s355_s1 = inlined_call_operand.vmem [shape: s32[8,1], index: 1, kind: input, shape index: {}]   ;;  %s356_s2 = inlined_call_operand.hbm [shape: f32[1,2,15], index: 2, kind: output, shape index: {}]  }
   0x1   :  { %v72_v0 = vld [vmem:[%s354_s0] sm:$0xff] }
   0x2   :  { %7 = vsyncpa [#allocation3], 0  ;;  %v75_v1 = vsel %vm74_vm0, %v72_v0, -inf  ;;  %v86_v2 = vlaneseq  ;;  %v313_v17 = vmov 0.0   ;;  %vm314_vm3 = vmmov 0   ;;  %v73_v22 = vld [vmem:[%s355_s1] sm:$0xff] }
   0x3   :  { %76 = vmax.xlane.f32.xlu0 %v75_v1  ;;  %275 = vmatprep.subr.mxu0 %v313_v17  ;;  %s315_s12 = smov 1   ;;  %v316_v31 = vmov 1.0   ;;  %vm131_vm8 = vcmask 7168   ;;  %vm70_vm9 = vcmask 115712   ;;  %vm166_vm10 = vcmask 64512   ;;  %s317_s1 = smov [#allocation2]  }
   0x4   :  { %v87_v3 = vand.u32 127, %v86_v2  ;;  %277 = vmatprep.mubr.msk.f32.mxu0 %vm314_vm3, %v313_v17  ;;  %71 = vst.msk [vmem:[#allocation2] sm:$0x3] %vm70_vm9, %v313_v17  ;;  %s249_s13 = sshll.u32 %s317_s1, 4  ;;  %s250_s13 = int_to_ptr.vmem [resolvable:$true] %s249_s13 }
   0x5   :  { %s289_s14 = scalar_lea.vmem %s250_s13, 32  ;;  %p294_p1 = scmp.lt.s32.totalorder %s250_s13, %s250_s13 }
   0x6   :  { %v117_v25 = vcvt.s32.f32 %v87_v3  ;;  %p290_p0 = scmp.ne.s32.totalorder %s250_s13, %s289_s14  ;;  %p295_p2 = scmp.lt.s32.totalorder %s289_s14, %s289_s14 }
   0x8   :  { %v120_v27 = vadd.f32 1.0, %v117_v25  ;;  %v119_v28 = vmul.f32 0.06666667, %v117_v25  ;;  %p296_p3 = por %p295_p2, %p294_p1 }
   0xa   :  { %v121_v29 = vmul.f32 0.06666667, %v120_v27  ;;  %p297_p4 = pnand %p296_p3, %p290_p0 }
   0xb   :  { %v133_v35 = vld [vmem:[#allocation2] sm:$0x3] }
  0x90   :  { %v77_v4 = vpop.xlane.xlu0 %76 }
  0x91   :  { %vm88_vm1 = vcmp.eq.f32.partialorder %v72_v0, %v77_v4  ;;  %v78_v9 = vsub.f32 %v72_v0, %v77_v4 }
  0x92   :  { %v89_v5 = vsel %vm88_vm1, %v87_v3, 16 }
  0x93   :  { %v90_v6 = vsel %vm74_vm0, %v89_v5, 2147483647  ;;  %v79_v10 = vmul.f32 1.442695, %v78_v9 }
  0x94   :  { %v92_v7 = vshra.s32 %v90_v6, 16  ;;  %v91_v11 = vand.u32 65535, %v90_v6 }
  0x95   :  { %285 = vpow2.f32 %v79_v10 }
  0x96   :  { %v94_v8 = vcvt.s32.f32 %v92_v7  ;;  %v93_v13 = vcvt.s32.f32 %v91_v11 }
  0x98   :  { %95 = vmin.xlane.f32.xlu0 %v94_v8 }
  0x9f   :  { %v286_v15 = vpop.eup %285 }
  0xa0   :  { %v81_v16 = vsel %vm74_vm0, %v286_v15, 0.0 }
 0x125   :  { %v96_v12 = vpop.xlane.xlu0 %95 }
 0x126   :  { %vm97_vm2 = vcmp.eq.f32.partialorder %v94_v8, %v96_v12  ;;  %v102_v18 = vcvt.f32.s32 %v96_v12 }
 0x127   :  { %v98_v14 = vsel %vm97_vm2, %v93_v13, inf }
 0x128   :  { %99 = vmin.xlane.f32.xlu1 %v98_v14  ;;  %v103_v20 = vshll.u32 %v102_v18, 16 }
 0x12c   :  { %82 = vadd.xlane.f32.xlu1 %v81_v16 }
 0x1b5   :  { %v100_v19 = vpop.xlane.xlu1 %99 }
 0x1b6   :  { %v101_v21 = vcvt.f32.s32 %v100_v19 }
 0x1b8   :  { %v104_v23 = vadd.s32 %v103_v20, %v101_v21 }
 0x1b9   :  { %v83_v24 = vpop.xlane.xlu1 %82 }
 0x1ba   :  { %287 = vrcp.f32 %v83_v24  ;;  %vm105_vm4 = vcmp.eq.s32.totalorder %v104_v23, %v73_v22 }
 0x1bb   :  { %v269_v26 = vsel %vm105_vm4, 1.0, %v313_v17 }
 0x1bc   :  { %128 = vrot.lane.b32.xlu0 %v269_v26, %s315_s12 }
 0x1c4   :  { %v288_v30 = vpop.eup %287 }
 0x1c5   :  { %vm122_vm5 = vcmp.gt.f32.partialorder %v288_v30, %v119_v28  ;;  %vm123_vm6 = vcmp.le.f32.partialorder %v288_v30, %v121_v29 }
 0x1c6   :  { %vm124_vm7 = vmand %vm122_vm5, %vm123_vm6 }
 0x1c7   :  { %276 = vmatpush3.msk.msra.mxu0 %vm124_vm7, %v316_v31 }
 0x22e   :  { %v129_v32 = vpop.permute.xlu0 %128 }
 0x22f   :  { %v132_v33 = vsel %vm131_vm8, %v288_v30, %v129_v32 }
 0x230   :  { %134 = vxpose.xlu1.b32.start.end [1/1] (short) (narrow) %v132_v33, 8 }
 0x2b0   :  { %v150_v34 = vpop.trf.xlu1 }
 0x2b1   :  { %278 = vmatmul.mubr.msk.f32.vlgmr.msra.gmra.mrb[0].mxu0 %vm166_vm10, %v150_v34 }
 0x384   :  { %v236_v36 = vpop.f32.mrb[0].mxu0 }
 0x385   :  { %v240_v37 = vadd.f32 %v236_v36, %v133_v35  ;;  %v279_v38 = vpop.f32.mrb[1].mxu0 }
 0x387   :  { %242 = vst.msk [vmem:[#allocation2] sm:$0x3] %vm70_vm9, %v240_v37 }
 0x388   :  { %300 = shalt.err (!%p297_p4)
}
 0x389   :  { %s301_s17 = scalar_lea.hbm %s356_s2, 32 }
 0x38a   :  { %p302_p5 = scmp.ne.s32.totalorder %s356_s2, %s301_s17  ;;  %p305_p6 = scmp.lt.u32.totalorder %s301_s17, %s356_s2 }
 0x38c   :  { %p307_p7 = pnand %p305_p6, %p302_p5 }
 0x38e   :  { %310 = shalt.err (!%p307_p7)
}
 0x38f   :  { %252 = dma.vmem_to_hbm [thread:$0]  %s250_s13, 32, %s356_s2, [#allocation3]  }
 0x390   :  { %311 = dma.done.wait [#allocation3], 32  }
 0x391   :  { %312 = vsyncadd [#allocation3], 4294967264 }
 0x392   :  { %256 = vsyncpa [#allocation3], 1 }

</bundles_post_ra>
